<compile_context>
chip_gen: v7x
topology: tpu7x:2x2x1
jax: 0.10.0
libtpu: 0.0.40
codegen_flags: <defaults>
</compile_context>

<pallas_src>
import math

import jax
import jax.numpy as jnp
from jax.experimental import pallas as pl
from jax.experimental.pallas import tpu as pltpu

_LANE = 128
_VMEM_LIMIT = 48 * 1024 * 1024


def _round_up(v, m):
    return ((v + m - 1) // m) * m


def _pad2d(a, rows, cols, dtype):
    """Cast to `dtype` and zero-pad to (rows, cols); no-op copy avoided."""
    a = a.astype(dtype)
    r, c = a.shape
    if r == rows and c == cols:
        return a
    return jnp.zeros((rows, cols), dtype).at[:r, :c].set(a)


# ----------------------------------------------------------------------------
# Small-graph path: single VMEM block, f32.
# ----------------------------------------------------------------------------
def _gcn_small_kernel(x_ref, a1_ref, a2_ref, w1_ref, w2_ref, o_ref):
    xw = jnp.dot(x_ref[...], w1_ref[...], preferred_element_type=jnp.float32)
    h = jnp.maximum(jnp.dot(a1_ref[...], xw, preferred_element_type=jnp.float32), 0.0)
    # (dropout: identity in eval mode)
    hw = jnp.dot(h, w2_ref[...], preferred_element_type=jnp.float32)
    o_ref[...] = jnp.dot(a2_ref[...], hw,
                         preferred_element_type=jnp.float32).astype(o_ref.dtype)


def _gcn_forward_small(x, a1, a2, w1, w2):
    n = x.shape[0]
    nclass = w2.shape[1]
    vmem = pl.BlockSpec(memory_space=pltpu.MemorySpace.VMEM)
    return pl.pallas_call(
        _gcn_small_kernel,
        out_shape=jax.ShapeDtypeStruct((n, nclass), jnp.float32),
        in_specs=[vmem] * 5,
        out_specs=vmem,
        compiler_params=pltpu.CompilerParams(vmem_limit_bytes=_VMEM_LIMIT),
    )(x, a1, a2, w1, w2)


# ----------------------------------------------------------------------------
# Large-graph path: tiled, bf16 inputs, f32 accumulation.
# ----------------------------------------------------------------------------
def _xw_kernel(x_ref, w_ref, o_ref):
    # xw = x @ W1, row-tiled; output is lane-dense (nhid padded to 128).
    o_ref[...] = jnp.dot(x_ref[...], w_ref[...],
                         preferred_element_type=jnp.float32).astype(o_ref.dtype)


def _layer1_kernel(a_ref, xw_ref, w2_ref, o_ref, acc_ref):
    # hw = relu(A1 @ xw) @ W2, accumulated over the K (node) axis.
    k = pl.program_id(1)

    @pl.when(k == 0)
    def _():
        acc_ref[...] = jnp.zeros_like(acc_ref)

    acc_ref[...] += jnp.dot(a_ref[...], xw_ref[...],
                            preferred_element_type=jnp.float32)

    @pl.when(k == pl.num_programs(1) - 1)
    def _():
        h = jnp.maximum(acc_ref[...], 0.0)
        # (dropout: identity in eval mode)
        # fuse conv2's feature transform into the writeback (W2 tiny, resident)
        o_ref[...] = jnp.dot(h.astype(w2_ref.dtype), w2_ref[...],
                             preferred_element_type=jnp.float32).astype(o_ref.dtype)


def _layer2_kernel(a_ref, hw_ref, o_ref, acc_ref):
    # out = A2 @ hw, accumulated over the K (node) axis.
    k = pl.program_id(1)

    @pl.when(k == 0)
    def _():
        acc_ref[...] = jnp.zeros_like(acc_ref)

    acc_ref[...] += jnp.dot(a_ref[...], hw_ref[...],
                            preferred_element_type=jnp.float32)

    @pl.when(k == pl.num_programs(1) - 1)
    def _():
        o_ref[...] = acc_ref[...].astype(o_ref.dtype)


def _gcn_forward_tiled(x, a1, a2, w1, w2, *, tm=512,
                       compute_dtype=jnp.bfloat16):
    n, nfeat = x.shape
    nhid = w1.shape[1]
    nclass = w2.shape[1]

    # Pad nodes to the row-tile grid; pick the largest K tile that divides it
    # (big per-step DMA without inflating adjacency zero-padding).
    n_pad = _round_up(n, tm)
    tk = 1024 if (n_pad % 1024 == 0) else tm
    nhid_p = _round_up(nhid, _LANE)
    nclass_p = _round_up(nclass, _LANE)

    # bf16 inputs (adjacency entries are small non-negative ints -> exact).
    xp = _pad2d(x, n_pad, nfeat, compute_dtype)
    a1p = _pad2d(a1, n_pad, n_pad, compute_dtype)
    a2p = _pad2d(a2, n_pad, n_pad, compute_dtype)
    w1p = _pad2d(w1, nfeat, nhid_p, compute_dtype)
    w2p = _pad2d(w2, nhid_p, nclass_p, compute_dtype)

    n_row = n_pad // tm
    n_k = n_pad // tk

    cp_2d = pltpu.CompilerParams(
        dimension_semantics=("parallel", "arbitrary"),
        vmem_limit_bytes=_VMEM_LIMIT)
    cp_1d = pltpu.CompilerParams(
        dimension_semantics=("parallel",),
        vmem_limit_bytes=_VMEM_LIMIT)

    # Prologue: xw = x @ W1 (computed once, kept resident, never recomputed).
    xw = pl.pallas_call(
        _xw_kernel,
        out_shape=jax.ShapeDtypeStruct((n_pad, nhid_p), compute_dtype),
        grid=(n_row,),
        in_specs=[pl.BlockSpec((tm, nfeat), lambda i: (i, 0)),
                  pl.BlockSpec((nfeat, nhid_p), lambda i: (0, 0))],
        out_specs=pl.BlockSpec((tm, nhid_p), lambda i: (i, 0)),
        compiler_params=cp_1d,
    )(xp, w1p)

    # Layer 1 (+ fused conv2 transform): hw = relu(A1 @ xw) @ W2
    hw = pl.pallas_call(
        _layer1_kernel,
        out_shape=jax.ShapeDtypeStruct((n_pad, nclass_p), compute_dtype),
        grid=(n_row, n_k),
        in_specs=[pl.BlockSpec((tm, tk), lambda i, k: (i, k)),
                  pl.BlockSpec((tk, nhid_p), lambda i, k: (k, 0)),
                  pl.BlockSpec((nhid_p, nclass_p), lambda i, k: (0, 0))],
        out_specs=pl.BlockSpec((tm, nclass_p), lambda i, k: (i, 0)),
        scratch_shapes=[pltpu.VMEM((tm, nhid_p), jnp.float32)],
        compiler_params=cp_2d,
    )(a1p, xw, w2p)

    # Layer 2 propagation: out = A2 @ hw
    out = pl.pallas_call(
        _layer2_kernel,
        out_shape=jax.ShapeDtypeStruct((n_pad, nclass_p), jnp.float32),
        grid=(n_row, n_k),
        in_specs=[pl.BlockSpec((tm, tk), lambda i, k: (i, k)),
                  pl.BlockSpec((tk, nclass_p), lambda i, k: (k, 0))],
        out_specs=pl.BlockSpec((tm, nclass_p), lambda i, k: (i, 0)),
        scratch_shapes=[pltpu.VMEM((tm, nclass_p), jnp.float32)],
        compiler_params=cp_2d,
    )(a2p, hw)

    return out[:n, :nclass]


# ----------------------------------------------------------------------------
# Dispatch
# ----------------------------------------------------------------------------
def gcn_net_forward(x, a1, a2, w1, w2, *, tile_threshold=512):
    """Forward pass of `Net` (eval mode) given dense adjacencies a1, a2."""
    n = x.shape[0]
    if n <= tile_threshold:
        return _gcn_forward_small(x, a1, a2, w1, w2)
    return _gcn_forward_tiled(x, a1, a2, w1, w2)


def edge_index_to_adj(edge_index, num_nodes):
    # PyG MessagePassing (flow='source_to_target', aggr='add'):
    #   out[dst] += x[src]  for each column (src, dst) of edge_index.
    src = edge_index[0]
    dst = edge_index[1]
    adj = jnp.zeros((num_nodes, num_nodes), jnp.float32)
    adj = adj.at[dst, src].add(1.0)
    return adj


def init_gcn_weight(key, in_channels, out_channels):
    # Matches GCNConv.reset_parameters: uniform(-stdv, stdv), stdv = 1/sqrt(out)
    stdv = 1.0 / math.sqrt(out_channels)
    return jax.random.uniform(
        key, (in_channels, out_channels), jnp.float32, minval=-stdv, maxval=stdv)


if __name__ == "__main__":
    key = jax.random.PRNGKey(0)
    nfeat, nhid, nclass = 16, 32, 8

    # ---- toy graph: single-block f32 path ----
    num_nodes, num_edges = 64, 128
    k_x, k_e1, k_e2, k_w1, k_w2, k_big = jax.random.split(key, 6)

    x = jax.random.normal(k_x, (num_nodes, nfeat), jnp.float32)
    ei1 = jax.random.randint(k_e1, (2, num_edges), 0, num_nodes)
    ei2 = jax.random.randint(k_e2, (2, num_edges), 0, num_nodes)
    w1 = init_gcn_weight(k_w1, nfeat, nhid)
    w2 = init_gcn_weight(k_w2, nhid, nclass)
    a1 = edge_index_to_adj(ei1, num_nodes)
    a2 = edge_index_to_adj(ei2, num_nodes)

    out = jax.block_until_ready(gcn_net_forward(x, a1, a2, w1, w2))
    ref = a2 @ (jnp.maximum(a1 @ (x @ w1), 0.0) @ w2)
    assert out.shape == (num_nodes, nclass)
    assert jnp.allclose(out, ref, atol=1e-4, rtol=1e-4)

    # ---- larger graph: tiled bf16 path (grid + f32 VMEM accumulators) ----
    n_big, e_big = 2048, 8192
    kb_x, kb_e1, kb_e2 = jax.random.split(k_big, 3)
    xb = jax.random.normal(kb_x, (n_big, nfeat), jnp.float32)
    a1b = edge_index_to_adj(jax.random.randint(kb_e1, (2, e_big), 0, n_big), n_big)
    a2b = edge_index_to_adj(jax.random.randint(kb_e2, (2, e_big), 0, n_big), n_big)

    outb = jax.block_until_ready(gcn_net_forward(xb, a1b, a2b, w1, w2))

    # Reference on the same bf16-quantized inputs (tiled path computes in
    # bf16 with f32 MXU accumulation).
    bf = jnp.bfloat16
    xq, a1q, a2q, w1q, w2q = (t.astype(bf).astype(jnp.float32)
                              for t in (xb, a1b, a2b, w1, w2))
    hq = jnp.maximum(
        jnp.dot(a1q, jnp.dot(xq, w1q, precision="highest"), precision="highest"),
        0.0)
    refb = jnp.dot(a2q, jnp.dot(hq, w2q, precision="highest"), precision="highest")
    assert outb.shape == (n_big, nclass)
    assert jnp.allclose(outb, refb, atol=1e-1, rtol=5e-2)

    print("KERNEL_OK")
</pallas_src>

<mosaic_0001>
module attributes {stable_mosaic.version = 11 : i64} {
  func.func @_gcn_small_kernel(%arg0: memref<64x16xf32, #tpu.memory_space<vmem>>, %arg1: memref<64x64xf32, #tpu.memory_space<vmem>>, %arg2: memref<64x64xf32, #tpu.memory_space<vmem>>, %arg3: memref<16x32xf32, #tpu.memory_space<vmem>>, %arg4: memref<32x8xf32, #tpu.memory_space<vmem>>, %arg5: memref<64x8xf32, #tpu.memory_space<vmem>>) attributes {dimension_semantics = [], scalar_prefetch = 0 : i64, scratch_operands = 0 : i64, tpu.core_type = #tpu.core_type<tc>} {
    %c0 = arith.constant 0 : index
    %c0_0 = arith.constant 0 : index
    %0 = vector.load %arg0[%c0, %c0_0] : memref<64x16xf32, #tpu.memory_space<vmem>>, vector<64x16xf32>
    %c0_1 = arith.constant 0 : index
    %c0_2 = arith.constant 0 : index
    %1 = vector.load %arg3[%c0_1, %c0_2] : memref<16x32xf32, #tpu.memory_space<vmem>>, vector<16x32xf32>
    %cst = arith.constant dense<0.000000e+00> : vector<64x32xf32>
    %2 = tpu.matmul %0, %1, %cst {dimension_numbers = #tpu.dot_dimension_numbers<[1], [0], [0], [1], [0, 0, 1, 1], [], []>} : vector<64x16xf32>, vector<16x32xf32>, vector<64x32xf32> -> vector<64x32xf32>
    %c0_3 = arith.constant 0 : index
    %c0_4 = arith.constant 0 : index
    %3 = vector.load %arg1[%c0_3, %c0_4] : memref<64x64xf32, #tpu.memory_space<vmem>>, vector<64x64xf32>
    %cst_5 = arith.constant dense<0.000000e+00> : vector<64x32xf32>
    %4 = tpu.matmul %3, %2, %cst_5 {dimension_numbers = #tpu.dot_dimension_numbers<[1], [0], [0], [1], [0, 0, 1, 1], [], []>} : vector<64x64xf32>, vector<64x32xf32>, vector<64x32xf32> -> vector<64x32xf32>
    %cst_6 = arith.constant 0.000000e+00 : f32
    %5 = vector.broadcast %cst_6 : f32 to vector<64x32xf32>
    %6 = arith.maximumf %4, %5 : vector<64x32xf32>
    %c0_7 = arith.constant 0 : index
    %c0_8 = arith.constant 0 : index
    %7 = vector.load %arg4[%c0_7, %c0_8] : memref<32x8xf32, #tpu.memory_space<vmem>>, vector<32x8xf32>
    %cst_9 = arith.constant dense<0.000000e+00> : vector<64x8xf32>
    %8 = tpu.matmul %6, %7, %cst_9 {dimension_numbers = #tpu.dot_dimension_numbers<[1], [0], [0], [1], [0, 0, 1, 1], [], []>} : vector<64x32xf32>, vector<32x8xf32>, vector<64x8xf32> -> vector<64x8xf32>
    %c0_10 = arith.constant 0 : index
    %c0_11 = arith.constant 0 : index
    %9 = vector.load %arg2[%c0_10, %c0_11] : memref<64x64xf32, #tpu.memory_space<vmem>>, vector<64x64xf32>
    %cst_12 = arith.constant dense<0.000000e+00> : vector<64x8xf32>
    %10 = tpu.matmul %9, %8, %cst_12 {dimension_numbers = #tpu.dot_dimension_numbers<[1], [0], [0], [1], [0, 0, 1, 1], [], []>} : vector<64x64xf32>, vector<64x8xf32>, vector<64x8xf32> -> vector<64x8xf32>
    %c0_13 = arith.constant 0 : index
    %c0_14 = arith.constant 0 : index
    %11 = vector.load %arg5[%c0_13, %c0_14] : memref<64x8xf32, #tpu.memory_space<vmem>>, vector<64x8xf32>
    tpu.vector_store %arg5[%c0_13, %c0_14], %10 {strides = array<i32>} : memref<64x8xf32, #tpu.memory_space<vmem>>, vector<64x8xf32>,
    return
  }
}

</mosaic_0001>

<bundles_post_ra>
// kernel: tpu_custom_call.1
= control target key start
LH: loop header
LB: loop body
LE: loop exit
PB: predicated region body
PF: predicated region fallthrough
CT: control target
= control target key end

     0   :  { %10 = vsyncpa [#allocation3], 0  ;;  %s862_s18 = smov [#allocation2]   ;;  %s1037_s0 = inlined_call_operand.vmem [shape: f32[64,16], index: 0, kind: input, shape index: {}]   ;;  %s1038_s1 = inlined_call_operand.vmem [shape: f32[64,64], index: 1, kind: input, shape index: {}]   ;;  %s1039_s2 = inlined_call_operand.hbm [shape: f32[64,64], index: 2, kind: input, shape index: {}]   ;;  %s1040_s3 = inlined_call_operand.vmem [shape: f32[16,32], index: 3, kind: input, shape index: {}]   ;;  %s1041_s4 = inlined_call_operand.vmem [shape: f32[32,8], index: 4, kind: input, shape index: {}]   ;;  %s1042_s5 = inlined_call_operand.vmem [shape: f32[64,8], index: 5, kind: output, shape index: {}]  }
   0x1   :  { %s20_s19 = sshll.u32 %s862_s18, 4  ;;  %s838_s22 = scalar_lea.hbm %s1039_s2, 1024  ;;  %s21_s19 = int_to_ptr.vmem [resolvable:$true] %s20_s19 }
   0x2   :  { %p839_p0 = scmp.ne.s32.totalorder %s1039_s2, %s838_s22  ;;  %p842_p1 = scmp.lt.u32.totalorder %s838_s22, %s1039_s2 }
   0x4   :  { %p844_p2 = pnand %p842_p1, %p839_p0 }
   0x6   :  { %847 = shalt.err (!%p844_p2)
}
   0x7   :  { %s848_s27 = scalar_lea.vmem %s21_s19, 1024  ;;  %p853_p4 = scmp.lt.s32.totalorder %s21_s19, %s21_s19 }
   0x8   :  { %p849_p3 = scmp.ne.s32.totalorder %s21_s19, %s848_s27  ;;  %p854_p5 = scmp.lt.s32.totalorder %s848_s27, %s848_s27 }
   0xa   :  { %p855_p6 = por %p854_p5, %p853_p4 }
   0xc   :  { %p856_p7 = pnand %p855_p6, %p849_p3 }
   0xe   :  { %859 = shalt.err (!%p856_p7)
}
   0xf   :  { %s863_s28 = smov 128   ;;  %s864_s29 = smov 8  }
  0x10   :  { %26 = dma.hbm_to_vmem [thread:$0]  %s1039_s2, 1024, %s21_s19, [#allocation3], %s863_s28, %s863_s28, %s864_s29  }
  0x11   :  { %860 = dma.done.wait [#allocation3], 1024  }
  0x12   :  { %861 = vsyncadd [#allocation3], 4294966272  ;;  %vm44_vm0 = vcmask 130048   ;;  %v42_v0 = vld [vmem:[%s1040_s3] sm:$0xff]  ;;  %v43_v1 = vld [vmem:[%s1040_s3 + $0x8] sm:$0xff]  ;;  %vm182_vm1 = vcmask 523264  }
  0x13   :  { %v34_v2 = vld [vmem:[%s1037_s0] sm:$0xff]  ;;  %v783_v3 = vpack.c.bf16 %v43_v1, %v42_v0  ;;  %v35_v4 = vld [vmem:[%s1037_s0 + $0x8] sm:$0xff]  ;;  %v36_v5 = vld [vmem:[%s1037_s0 + $0x10] sm:$0xff]  ;;  %vm324_vm2 = vcmask 261120   ;;  %vm591_vm3 = vcmask 64512  }
  0x14   :  { %695 = vmatprep.mubr.msk.f32.mxu0 %vm44_vm0, %v34_v2  ;;  %v37_v6 = vld [vmem:[%s1037_s0 + $0x18] sm:$0xff]  ;;  %v38_v7 = vld [vmem:[%s1037_s0 + $0x20] sm:$0xff]  ;;  %v39_v8 = vld [vmem:[%s1037_s0 + $0x28] sm:$0xff] }
  0x15   :  { %784 = vmatprep.subr.bf16.mxu0 %v783_v3  ;;  %v40_v9 = vld [vmem:[%s1037_s0 + $0x30] sm:$0xff]  ;;  %v41_v10 = vld [vmem:[%s1037_s0 + $0x38] sm:$0xff]  ;;  %v174_v11 = vld [vmem:[%s1038_s1] sm:$0xff] }
  0x16   :  { %786 = vmatpush3.bf16.msra.mxu0 %v783_v3  ;;  %723 = vmatprep.mubr.msk.f32.mxu1 %vm182_vm1, %v174_v11  ;;  %v320_v12 = vld [vmem:[%s1041_s4] sm:$0xff]  ;;  %v321_v13 = vld [vmem:[%s1041_s4 + $0x8] sm:$0xff]  ;;  %v322_v14 = vld [vmem:[%s1041_s4 + $0x10] sm:$0xff] }
  0x17   :  { %v803_v15 = vpack.c.bf16 %v321_v13, %v320_v12  ;;  %v323_v16 = vld [vmem:[%s1041_s4 + $0x18] sm:$0xff]  ;;  %v175_v30 = vld [vmem:[%s1038_s1 + $0x8] sm:$0xff]  ;;  %v176_v31 = vld [vmem:[%s1038_s1 + $0x10] sm:$0xff] }
  0x18   :  { %v807_v17 = vpack.c.bf16 %v323_v16, %v322_v14  ;;  %v177_v32 = vld [vmem:[%s1038_s1 + $0x18] sm:$0xff]  ;;  %v178_v33 = vld [vmem:[%s1038_s1 + $0x20] sm:$0xff]  ;;  %v179_v34 = vld [vmem:[%s1038_s1 + $0x28] sm:$0xff] }
  0x19   :  { %696 = vmatmul.mubr.msk.f32.vlgmr.msra.gmra.mrb[0].mxu0 %vm44_vm0, %v35_v4  ;;  %804 = vmatprep.subr.bf16.mxu0 %v803_v15  ;;  %v180_v35 = vld [vmem:[%s1038_s1 + $0x30] sm:$0xff]  ;;  %v181_v36 = vld [vmem:[%s1038_s1 + $0x38] sm:$0xff]  ;;  %v454_v54 = vld [vmem:[#allocation2] sm:$0xff] }
  0x1a   :  { %698 = vmatprep.mubr.msk.f32.mxu0 %vm44_vm0, %v36_v5  ;;  %806 = vmatpush3.bf16.msra.mxu0 %v803_v15  ;;  %v456_v53 = vld [vmem:[#allocation2 + $0x10] sm:$0xff]  ;;  %v457_v3 = vld [vmem:[#allocation2 + $0x18] sm:$0xff]  ;;  %v455_v4 = vld [vmem:[#allocation2 + $0x8] sm:$0xff] }
  0x1b   :  { %808 = vmatprep.subr.bf16.mxu0 %v807_v17  ;;  %v458_v5 = vld [vmem:[#allocation2 + $0x20] sm:$0xff] }
  0x1d   :  { %699 = vmatmul.mubr.msk.f32.gmra.mrb[2].mxu0 %vm44_vm0, %v37_v6  ;;  %v459_v6 = vld [vmem:[#allocation2 + $0x28] sm:$0xff] }
  0x1e   :  { %701 = vmatprep.mubr.msk.f32.mxu0 %vm44_vm0, %v38_v7  ;;  %810 = vmatpush3.bf16.msra.mxu0 %v807_v17  ;;  %v460_v7 = vld [vmem:[#allocation2 + $0x30] sm:$0xff] }
  0x21   :  { %702 = vmatmul.mubr.msk.f32.gmra.mrb[4].mxu0 %vm44_vm0, %v39_v8  ;;  %v461_v8 = vld [vmem:[#allocation2 + $0x38] sm:$0xff] }
  0x22   :  { %704 = vmatprep.mubr.msk.f32.mxu0 %vm44_vm0, %v40_v9 }
  0x25   :  { %705 = vmatmul.mubr.msk.f32.gmra.mrb[6].mxu0 %vm44_vm0, %v41_v10 }
  0xec   :  { %v697_v18 = vpop.f32.mrb[0].mxu0 }
  0xed   :  { %v135_v19 = vpop.f32.mrb[1].mxu0 }
  0xee   :  { %v787_v20 = vpack.c.bf16 %v697_v18, %v135_v19 }
  0xf0   :  { %v700_v21 = vpop.f32.mrb[2].mxu0  ;;  %788 = vmatprep.subr.bf16.mxu1 %v787_v20 }
  0xf1   :  { %v145_v22 = vpop.f32.mrb[3].mxu0  ;;  %790 = vmatpush3.bf16.msra.mxu1 %v787_v20 }
  0xf2   :  { %v791_v23 = vpack.c.bf16 %v700_v21, %v145_v22 }
  0xf4   :  { %v703_v24 = vpop.f32.mrb[4].mxu0  ;;  %792 = vmatprep.subr.bf16.mxu1 %v791_v23 }
  0xf5   :  { %v155_v25 = vpop.f32.mrb[5].mxu0  ;;  %794 = vmatpush3.bf16.msra.mxu1 %v791_v23 }
  0xf6   :  { %v795_v26 = vpack.c.bf16 %v703_v24, %v155_v25 }
  0xf8   :  { %v706_v27 = vpop.f32.mrb[6].mxu0  ;;  %796 = vmatprep.subr.bf16.mxu1 %v795_v26 }
  0xf9   :  { %v165_v28 = vpop.f32.mrb[7].mxu0  ;;  %798 = vmatpush3.bf16.msra.mxu1 %v795_v26 }
  0xfa   :  { %v799_v29 = vpack.c.bf16 %v706_v27, %v165_v28 }
  0xfc   :  { %800 = vmatprep.subr.bf16.mxu1 %v799_v29 }
  0xfd   :  { %802 = vmatpush3.bf16.msra.mxu1 %v799_v29 }
 0x100   :  { %724 = vmatmul.mubr.msk.f32.vlgmr.msra.gmra.mrb[0].mxu1 %vm182_vm1, %v175_v30 }
 0x101   :  { %726 = vmatprep.mubr.msk.f32.mxu1 %vm182_vm1, %v176_v31 }
 0x104   :  { %727 = vmatmul.mubr.msk.f32.gmra.mrb[2].mxu1 %vm182_vm1, %v177_v32 }
 0x105   :  { %729 = vmatprep.mubr.msk.f32.mxu1 %vm182_vm1, %v178_v33 }
 0x108   :  { %730 = vmatmul.mubr.msk.f32.gmra.mrb[4].mxu1 %vm182_vm1, %v179_v34 }
 0x109   :  { %732 = vmatprep.mubr.msk.f32.mxu1 %vm182_vm1, %v180_v35 }
 0x10c   :  { %733 = vmatmul.mubr.msk.f32.gmra.mrb[6].mxu1 %vm182_vm1, %v181_v36 }
 0x10d   :  { %774 = vmatprep.mubr.msk.f32.mxu1 %vm182_vm1, %v456_v53 }
 0x1d3   :  { %v725_v37 = vpop.f32.mrb[0].mxu1 }
 0x1d4   :  { %v273_v38 = vpop.f32.mrb[1].mxu1  ;;  %v313_v40 = vmax.f32 %v725_v37, 0.0 }
 0x1d5   :  { %v312_v39 = vmax.f32 %v273_v38, 0.0 }
 0x1d7   :  { %v728_v41 = vpop.f32.mrb[2].mxu1  ;;  %743 = vmatprep.mubr.msk.f32.mxu0 %vm324_vm2, %v312_v39 }
 0x1d8   :  { %v283_v42 = vpop.f32.mrb[3].mxu1  ;;  %744 = vmatmul.mubr.msk.f32.vlgmr.msra.gmra.mrb[8].mxu0 %vm324_vm2, %v313_v40  ;;  %v315_v44 = vmax.f32 %v728_v41, 0.0 }
 0x1d9   :  { %v314_v43 = vmax.f32 %v283_v42, 0.0 }
 0x1db   :  { %v731_v45 = vpop.f32.mrb[4].mxu1  ;;  %746 = vmatprep.mubr.msk.f32.mxu0 %vm324_vm2, %v314_v43 }
 0x1dc   :  { %v293_v46 = vpop.f32.mrb[5].mxu1  ;;  %747 = vmatmul.mubr.msk.f32.gmra.mrb[10].mxu0 %vm324_vm2, %v315_v44  ;;  %v317_v48 = vmax.f32 %v731_v45, 0.0 }
 0x1dd   :  { %v316_v47 = vmax.f32 %v293_v46, 0.0 }
 0x1df   :  { %v734_v49 = vpop.f32.mrb[6].mxu1  ;;  %749 = vmatprep.mubr.msk.f32.mxu0 %vm324_vm2, %v316_v47 }
 0x1e0   :  { %v303_v50 = vpop.f32.mrb[7].mxu1  ;;  %750 = vmatmul.mubr.msk.f32.gmra.mrb[12].mxu0 %vm324_vm2, %v317_v48  ;;  %v319_v52 = vmax.f32 %v734_v49, 0.0 }
 0x1e1   :  { %v318_v51 = vmax.f32 %v303_v50, 0.0 }
 0x1e3   :  { %752 = vmatprep.mubr.msk.f32.mxu0 %vm324_vm2, %v318_v51 }
 0x1e4   :  { %753 = vmatmul.mubr.msk.f32.gmra.mrb[14].mxu0 %vm324_vm2, %v319_v52 }
 0x1e5   :  { %771 = vmatprep.mubr.msk.f32.mxu0 %vm182_vm1, %v454_v54 }
 0x2ab   :  { %v745_v55 = vpop.f32.mrb[8].mxu0 }
 0x2ac   :  { %v415_v56 = vpop.f32.mrb[9].mxu0 }
 0x2ad   :  { %v811_v57 = vpack.c.bf16 %v745_v55, %v415_v56 }
 0x2af   :  { %v748_v58 = vpop.f32.mrb[10].mxu0  ;;  %812 = vmatprep.subr.bf16.mxu0 %v811_v57  ;;  %827 = vmatprep.subr.bf16.mxu1 %v811_v57 }
 0x2b0   :  { %v425_v59 = vpop.f32.mrb[11].mxu0  ;;  %814 = vmatpush3.bf16.msra.mxu0 %v811_v57  ;;  %831 = vmatpush3.bf16.msra.mxu1 %v811_v57 }
 0x2b1   :  { %v815_v60 = vpack.c.bf16 %v748_v58, %v425_v59 }
 0x2b3   :  { %v751_v61 = vpop.f32.mrb[12].mxu0  ;;  %816 = vmatprep.subr.bf16.mxu0 %v815_v60  ;;  %828 = vmatprep.subr.bf16.mxu1 %v815_v60 }
 0x2b4   :  { %v435_v62 = vpop.f32.mrb[13].mxu0  ;;  %818 = vmatpush3.bf16.msra.mxu0 %v815_v60  ;;  %832 = vmatpush3.bf16.msra.mxu1 %v815_v60 }
 0x2b5   :  { %v819_v63 = vpack.c.bf16 %v751_v61, %v435_v62 }
 0x2b7   :  { %v754_v0 = vpop.f32.mrb[14].mxu0  ;;  %820 = vmatprep.subr.bf16.mxu0 %v819_v63  ;;  %829 = vmatprep.subr.bf16.mxu1 %v819_v63 }
 0x2b8   :  { %v445_v1 = vpop.f32.mrb[15].mxu0  ;;  %822 = vmatpush3.bf16.msra.mxu0 %v819_v63  ;;  %833 = vmatpush3.bf16.msra.mxu1 %v819_v63 }
 0x2b9   :  { %v823_v2 = vpack.c.bf16 %v754_v0, %v445_v1 }
 0x2bb   :  { %824 = vmatprep.subr.bf16.mxu0 %v823_v2  ;;  %830 = vmatprep.subr.bf16.mxu1 %v823_v2 }
 0x2bc   :  { %826 = vmatpush3.bf16.msra.mxu0 %v823_v2  ;;  %834 = vmatpush3.bf16.msra.mxu1 %v823_v2 }
 0x2bf   :  { %775 = vmatmul.mubr.msk.f32.vlgmr.msra.gmra.mrb[8].mxu1 %vm182_vm1, %v457_v3  ;;  %772 = vmatmul.mubr.msk.f32.vlgmr.msra.gmra.mrb[16].mxu0 %vm182_vm1, %v455_v4 }
 0x2c0   :  { %777 = vmatprep.mubr.msk.f32.mxu1 %vm182_vm1, %v458_v5 }
 0x2c3   :  { %778 = vmatmul.mubr.msk.f32.gmra.mrb[10].mxu1 %vm182_vm1, %v459_v6 }
 0x2c4   :  { %780 = vmatprep.mubr.msk.f32.mxu1 %vm182_vm1, %v460_v7 }
 0x2c7   :  { %781 = vmatmul.mubr.msk.f32.gmra.mrb[12].mxu1 %vm182_vm1, %v461_v8 }
 0x392   :  { %v776_v9 = vpop.f32.mrb[8].mxu1  ;;  %v773_v10 = vpop.f32.mrb[16].mxu0 }
 0x393   :  { %595 = vst.msk [vmem:[%s1042_s5 + $0x18] sm:$0xff] %vm591_vm3, %v776_v9  ;;  %v562_v11 = vpop.f32.mrb[9].mxu1  ;;  %593 = vst.msk [vmem:[%s1042_s5 + $0x8] sm:$0xff] %vm591_vm3, %v773_v10  ;;  %v552_v12 = vpop.f32.mrb[17].mxu0 }
 0x394   :  { %594 = vst.msk [vmem:[%s1042_s5 + $0x10] sm:$0xff] %vm591_vm3, %v562_v11  ;;  %592 = vst.msk [vmem:[%s1042_s5] sm:$0xff] %vm591_vm3, %v552_v12 }
 0x396   :  { %v779_v13 = vpop.f32.mrb[10].mxu1 }
 0x397   :  { %597 = vst.msk [vmem:[%s1042_s5 + $0x28] sm:$0xff] %vm591_vm3, %v779_v13  ;;  %v572_v14 = vpop.f32.mrb[11].mxu1 }
 0x398   :  { %596 = vst.msk [vmem:[%s1042_s5 + $0x20] sm:$0xff] %vm591_vm3, %v572_v14 }
 0x39a   :  { %v782_v15 = vpop.f32.mrb[12].mxu1 }
 0x39b   :  { %599 = vst.msk [vmem:[%s1042_s5 + $0x38] sm:$0xff] %vm591_vm3, %v782_v15  ;;  %v582_v16 = vpop.f32.mrb[13].mxu1 }
 0x39c   :  { %598 = vst.msk [vmem:[%s1042_s5 + $0x30] sm:$0xff] %vm591_vm3, %v582_v16 }
 0x39d   :  { %604 = vsyncpa [#allocation3], 1 }

</bundles_post_ra>
